<compile_context>
chip_gen: v7x
topology: tpu7x:2x2x1
jax: 0.10.0
libtpu: 0.0.40
codegen_flags: <defaults>
</compile_context>

<pallas_src>
import functools
import math

import jax
import jax.numpy as jnp
import numpy as np
from jax import lax
from jax.experimental import pallas as pl
from jax.experimental.pallas import tpu as pltpu

LN_EPS = 1e-5
VMEM_LIMIT = 64 * 1024 * 1024  # fits v7x's 64 MiB physical VMEM; well under v5e/v6e's 128 MiB


def _layernorm(x, gamma, beta):
    # x: (T, D) f32; gamma/beta: (1, D) f32.  Biased variance, matches nn.LayerNorm.
    mu = jnp.mean(x, axis=-1, keepdims=True)
    xc = x - mu
    var = jnp.mean(xc * xc, axis=-1, keepdims=True)
    return xc * lax.rsqrt(var + LN_EPS) * gamma + beta


def _seq_tile(s):
    for t in (256, 128):
        if s % t == 0:
            return t
    return s  # small / unaligned S fallback (full-extent block)


def _ff_tile(dff):
    for t in (512, 256, 128):
        if dff % t == 0:
            return t
    return dff


# ---------------------------------------------------------------------------
# Kernel 1: fused Q/K/V projection -> bf16 (B, H, S, hd), scale folded into Q.
# ---------------------------------------------------------------------------
def qkv_proj_kernel(x_ref, wq_ref, bq_ref, wk_ref, bk_ref, wv_ref, bv_ref,
                    q_ref, k_ref, v_ref, *, q_scale: float):
    f32 = jnp.float32
    xb = x_ref[0]  # (TP, D) bf16 (host-cast)
    q = jnp.dot(xb, wq_ref[0], preferred_element_type=f32) + bq_ref[0]
    k = jnp.dot(xb, wk_ref[0], preferred_element_type=f32) + bk_ref[0]
    v = jnp.dot(xb, wv_ref[0], preferred_element_type=f32) + bv_ref[0]
    q_ref[0, 0] = (q * q_scale).astype(q_ref.dtype)
    k_ref[0, 0] = k.astype(k_ref.dtype)
    v_ref[0, 0] = v.astype(v_ref.dtype)


# ---------------------------------------------------------------------------
# Kernel 2: flash attention (online softmax over KV tiles) + W_O + LN1 + residual.
# ---------------------------------------------------------------------------
def attn_ln_kernel(xq_ref, q_ref, k_ref, v_ref, wo_ref, bo_ref, g1_ref, be1_ref,
                   x1_ref, m_s, l_s, acc_s, attn_s):
    h = pl.program_id(2)
    ki = pl.program_id(3)
    nh = pl.num_programs(2)
    nk = pl.num_programs(3)
    bf16 = jnp.bfloat16
    f32 = jnp.float32

    # Fresh attention-output accumulator at the start of each (batch, q-tile).
    @pl.when(jnp.logical_and(h == 0, ki == 0))
    def _init_tile():
        attn_s[...] = jnp.zeros_like(attn_s)

    # Reset online-softmax state per head.
    @pl.when(ki == 0)
    def _init_head():
        m_s[...] = jnp.full_like(m_s, -jnp.inf)
        l_s[...] = jnp.zeros_like(l_s)
        acc_s[...] = jnp.zeros_like(acc_s)

    q = q_ref[0, 0]  # (TQ, hd) bf16, already scaled by 1/sqrt(hd)
    k = k_ref[0, 0]  # (TK, hd) bf16
    v = v_ref[0, 0]  # (TK, hd) bf16

    # Scores: contract on head_dim of both operands (MXU trans_b, no XLU transpose).
    s = lax.dot_general(q, k, (((1,), (1,)), ((), ())),
                        preferred_element_type=f32)  # (TQ, TK) f32

    # Online (flash) softmax.  exp is evaluated on bf16 inputs (EUP throughput on v6e/v7x);
    # the running max / denominator stay f32.
    m_prev = m_s[...]
    m_new = jnp.maximum(m_prev, jnp.max(s, axis=-1, keepdims=True))
    alpha = jnp.exp(m_prev - m_new)                              # (TQ, 1) f32
    p = jnp.exp((s - m_new).astype(bf16))                        # (TQ, TK) bf16
    l_s[...] = alpha * l_s[...] + jnp.sum(p.astype(f32), axis=-1, keepdims=True)
    acc_s[...] = alpha * acc_s[...] + jnp.dot(p, v, preferred_element_type=f32)
    m_s[...] = m_new

    # Last KV tile of this head: normalize and apply this head's slice of W_O.
    @pl.when(ki == nk - 1)
    def _finish_head():
        ctx = acc_s[...] * pl.reciprocal(l_s[...], approx=True)  # (TQ, hd) f32
        attn_s[...] += jnp.dot(ctx.astype(bf16), wo_ref[0], preferred_element_type=f32)

    # Very last (head, kv) step: bias, LayerNorm, residual with f32 x.
    @pl.when(jnp.logical_and(h == nh - 1, ki == nk - 1))
    def _finish_tile():
        attn = attn_s[...] + bo_ref[...]                         # (TQ, D) f32
        xq = xq_ref[0]                                           # (TQ, D) f32 residual
        x1_ref[0] = (xq + _layernorm(attn, g1_ref[...], be1_ref[...])).astype(x1_ref.dtype)


# ---------------------------------------------------------------------------
# Kernel 3: FFN (K-tiled over d_ff) + LN2 + residual.
# ---------------------------------------------------------------------------
def ffn_ln_kernel(x1_ref, w1_ref, b1_ref, w2_ref, b2_ref, g2_ref, be2_ref,
                  out_ref, x1b_s, acc_s):
    f = pl.program_id(2)
    nf = pl.num_programs(2)
    bf16 = jnp.bfloat16
    f32 = jnp.float32

    @pl.when(f == 0)
    def _init():
        x1b_s[...] = x1_ref[0].astype(bf16)   # cast once per (b, q-tile)
        acc_s[...] = jnp.zeros_like(acc_s)

    ht = jnp.dot(x1b_s[...], w1_ref[...], preferred_element_type=f32) + b1_ref[...]
    ht = jnp.maximum(ht, 0.0)                                    # ReLU is per-f-tile safe
    acc_s[...] += jnp.dot(ht.astype(bf16), w2_ref[...], preferred_element_type=f32)

    @pl.when(f == nf - 1)
    def _finish():
        x1 = x1_ref[0]                                           # f32 residual
        ff = acc_s[...] + b2_ref[...]
        out_ref[0] = (x1 + _layernorm(ff, g2_ref[...], be2_ref[...])).astype(out_ref.dtype)


# ---------------------------------------------------------------------------
# Host wrapper.
# ---------------------------------------------------------------------------
def transformer_layer(x, params, n_heads):
    """x: (B, S, D) float32. params: (in, out)-oriented f32 weights (see init_params)."""
    B, S, D = x.shape
    Dff = params["w1"].shape[1]
    assert D % n_heads == 0
    hd = D // n_heads
    bf16 = jnp.bfloat16
    f32 = jnp.float32

    TP = _seq_tile(S)
    TQ = _seq_tile(S)
    TK = _seq_tile(S)
    TF = _ff_tile(Dff)
    nsp, nq, nk, nf = S // TP, S // TQ, S // TK, Dff // TF

    # Host-side weight / activation prep: bf16 storage + per-head-leading layouts so the
    # kernels never slice the lane dimension.
    x_bf = x.astype(bf16)                                                         # KV / proj stream
    wq_r = params["wq"].reshape(D, n_heads, hd).transpose(1, 0, 2).astype(bf16)   # (H, D, hd)
    wk_r = params["wk"].reshape(D, n_heads, hd).transpose(1, 0, 2).astype(bf16)
    wv_r = params["wv"].reshape(D, n_heads, hd).transpose(1, 0, 2).astype(bf16)
    wo_r = params["wo"].reshape(n_heads, hd, D).astype(bf16)                      # (H, hd, D)
    bq_r = params["bq"].reshape(n_heads, 1, hd)
    bk_r = params["bk"].reshape(n_heads, 1, hd)
    bv_r = params["bv"].reshape(n_heads, 1, hd)
    w1 = params["w1"].astype(bf16)
    w2 = params["w2"].astype(bf16)

    # ---- 1) Q/K/V projection (heads innermost so the x tile is not re-DMA'd per head) ----
    qkv_shape = jax.ShapeDtypeStruct((B, n_heads, S, hd), bf16)
    qkv_out_spec = pl.BlockSpec((1, 1, TP, hd), lambda b, si, h: (b, h, si, 0))
    head_w_spec = pl.BlockSpec((1, D, hd), lambda b, si, h: (h, 0, 0))
    head_b_spec = pl.BlockSpec((1, 1, hd), lambda b, si, h: (h, 0, 0))

    q_all, k_all, v_all = pl.pallas_call(
        functools.partial(qkv_proj_kernel, q_scale=1.0 / math.sqrt(hd)),
        out_shape=(qkv_shape, qkv_shape, qkv_shape),
        grid_spec=pltpu.PrefetchScalarGridSpec(
            num_scalar_prefetch=0,
            grid=(B, nsp, n_heads),
            in_specs=[
                pl.BlockSpec((1, TP, D), lambda b, si, h: (b, si, 0)),   # x (bf16)
                head_w_spec, head_b_spec,                                # wq, bq
                head_w_spec, head_b_spec,                                # wk, bk
                head_w_spec, head_b_spec,                                # wv, bv
            ],
            out_specs=[qkv_out_spec, qkv_out_spec, qkv_out_spec],
        ),
        compiler_params=pltpu.CompilerParams(
            dimension_semantics=("parallel", "parallel", "parallel"),
            vmem_limit_bytes=VMEM_LIMIT,
        ),
    )(x_bf, wq_r, bq_r, wk_r, bk_r, wv_r, bv_r)

    # ---- 2) flash attention + W_O + LN1 + residual ----
    x1 = pl.pallas_call(
        attn_ln_kernel,
        out_shape=jax.ShapeDtypeStruct((B, S, D), f32),
        grid_spec=pltpu.PrefetchScalarGridSpec(
            num_scalar_prefetch=0,
            grid=(B, nq, n_heads, nk),
            in_specs=[
                pl.BlockSpec((1, TQ, D), lambda b, qi, h, ki: (b, qi, 0)),       # x f32 (residual)
                pl.BlockSpec((1, 1, TQ, hd), lambda b, qi, h, ki: (b, h, qi, 0)),  # Q
                pl.BlockSpec((1, 1, TK, hd), lambda b, qi, h, ki: (b, h, ki, 0)),  # K
                pl.BlockSpec((1, 1, TK, hd), lambda b, qi, h, ki: (b, h, ki, 0)),  # V
                pl.BlockSpec((1, hd, D), lambda b, qi, h, ki: (h, 0, 0)),        # wo (per head)
                pl.BlockSpec((1, D), lambda b, qi, h, ki: (0, 0)),               # bo
                pl.BlockSpec((1, D), lambda b, qi, h, ki: (0, 0)),               # gamma1
                pl.BlockSpec((1, D), lambda b, qi, h, ki: (0, 0)),               # beta1
            ],
            out_specs=pl.BlockSpec((1, TQ, D), lambda b, qi, h, ki: (b, qi, 0)),
            scratch_shapes=[
                pltpu.VMEM((TQ, 1), f32),    # running max
                pltpu.VMEM((TQ, 1), f32),    # running denom
                pltpu.VMEM((TQ, hd), f32),   # running per-head context
                pltpu.VMEM((TQ, D), f32),    # attention output accumulator
            ],
        ),
        compiler_params=pltpu.CompilerParams(
            dimension_semantics=("parallel", "parallel", "arbitrary", "arbitrary"),
            vmem_limit_bytes=VMEM_LIMIT,
        ),
    )(x, q_all, k_all, v_all, wo_r, params["bo"], params["g1"], params["be1"])

    # ---- 3) FFN (d_ff tiled on the grid) + LN2 + residual ----
    out = pl.pallas_call(
        ffn_ln_kernel,
        out_shape=jax.ShapeDtypeStruct((B, S, D), x.dtype),
        grid_spec=pltpu.PrefetchScalarGridSpec(
            num_scalar_prefetch=0,
            grid=(B, nq, nf),
            in_specs=[
                pl.BlockSpec((1, TQ, D), lambda b, qi, f: (b, qi, 0)),   # x1 (residual + input)
                pl.BlockSpec((D, TF), lambda b, qi, f: (0, f)),          # w1 tile
                pl.BlockSpec((1, TF), lambda b, qi, f: (0, f)),          # b1 tile
                pl.BlockSpec((TF, D), lambda b, qi, f: (f, 0)),          # w2 tile
                pl.BlockSpec((1, D), lambda b, qi, f: (0, 0)),           # b2
                pl.BlockSpec((1, D), lambda b, qi, f: (0, 0)),           # gamma2
                pl.BlockSpec((1, D), lambda b, qi, f: (0, 0)),           # beta2
            ],
            out_specs=pl.BlockSpec((1, TQ, D), lambda b, qi, f: (b, qi, 0)),
            scratch_shapes=[
                pltpu.VMEM((TQ, D), bf16),   # bf16 copy of x1 tile (cast once)
                pltpu.VMEM((TQ, D), f32),    # FFN accumulator over d_ff tiles
            ],
        ),
        compiler_params=pltpu.CompilerParams(
            dimension_semantics=("parallel", "parallel", "arbitrary"),
            vmem_limit_bytes=VMEM_LIMIT,
        ),
    )(x1, w1, params["b1"], w2, params["b2"], params["g2"], params["be2"])

    return out


# ---------------------------------------------------------------------------
# Pure-JAX reference (identical forward semantics) and parameter init.
# ---------------------------------------------------------------------------
def reference_layer(x, params, n_heads):
    B, S, D = x.shape
    hd = D // n_heads

    def ln(v, g, b):
        mu = jnp.mean(v, axis=-1, keepdims=True)
        var = jnp.mean((v - mu) ** 2, axis=-1, keepdims=True)
        return (v - mu) / jnp.sqrt(var + LN_EPS) * g + b

    q = x @ params["wq"] + params["bq"]
    k = x @ params["wk"] + params["bk"]
    v = x @ params["wv"] + params["bv"]
    q = q.reshape(B, S, n_heads, hd).transpose(0, 2, 1, 3)
    k = k.reshape(B, S, n_heads, hd).transpose(0, 2, 1, 3)
    v = v.reshape(B, S, n_heads, hd).transpose(0, 2, 1, 3)
    s = jnp.einsum("bhqd,bhkd->bhqk", q, k) / math.sqrt(hd)
    p = jax.nn.softmax(s, axis=-1)
    attn = jnp.einsum("bhqk,bhkd->bhqd", p, v).transpose(0, 2, 1, 3).reshape(B, S, D)
    attn = attn @ params["wo"] + params["bo"]

    x1 = x + ln(attn, params["g1"], params["be1"])
    h = jnp.maximum(x1 @ params["w1"] + params["b1"], 0.0)
    ff = h @ params["w2"] + params["b2"]
    return x1 + ln(ff, params["g2"], params["be2"])


def init_params(key, d_model, d_ff):
    keys = jax.random.split(key, 12)
    s = 0.1
    return {
        "wq": s * jax.random.normal(keys[0], (d_model, d_model), jnp.float32),
        "bq": s * jax.random.normal(keys[1], (1, d_model), jnp.float32),
        "wk": s * jax.random.normal(keys[2], (d_model, d_model), jnp.float32),
        "bk": s * jax.random.normal(keys[3], (1, d_model), jnp.float32),
        "wv": s * jax.random.normal(keys[4], (d_model, d_model), jnp.float32),
        "bv": s * jax.random.normal(keys[5], (1, d_model), jnp.float32),
        "wo": s * jax.random.normal(keys[6], (d_model, d_model), jnp.float32),
        "bo": s * jax.random.normal(keys[7], (1, d_model), jnp.float32),
        "g1": jnp.ones((1, d_model), jnp.float32),
        "be1": jnp.zeros((1, d_model), jnp.float32),
        "w1": s * jax.random.normal(keys[8], (d_model, d_ff), jnp.float32),
        "b1": s * jax.random.normal(keys[9], (1, d_ff), jnp.float32),
        "w2": s * jax.random.normal(keys[10], (d_ff, d_model), jnp.float32),
        "b2": s * jax.random.normal(keys[11], (1, d_model), jnp.float32),
        "g2": jnp.ones((1, d_model), jnp.float32),
        "be2": jnp.zeros((1, d_model), jnp.float32),
    }


if __name__ == "__main__":
    B, S, D, H = 2, 8, 32, 4
    D_FF = 4 * D

    key = jax.random.PRNGKey(0)
    k_x, k_p = jax.random.split(key)
    x = jax.random.normal(k_x, (B, S, D), jnp.float32)
    params = init_params(k_p, D, D_FF)

    out = jax.block_until_ready(transformer_layer(x, params, n_heads=H))

    # Compare against an f32 reference run with the same bf16-rounded weight matrices the
    # kernels consume (remaining diff = bf16 activation rounding + approx reciprocal).
    params_ref = dict(params)
    for name in ("wq", "wk", "wv", "wo", "w1", "w2"):
        params_ref[name] = params[name].astype(jnp.bfloat16).astype(jnp.float32)
    ref = jax.block_until_ready(reference_layer(x, params_ref, n_heads=H))

    np.testing.assert_allclose(np.asarray(out), np.asarray(ref), rtol=3e-2, atol=3e-2)
    print("KERNEL_OK")
</pallas_src>

<mosaic_0001>
module attributes {stable_mosaic.version = 11 : i64} {
  func.func @qkv_proj_kernel(%arg0: i32, %arg1: i32, %arg2: i32, %arg3: memref<1x8x32xbf16, #tpu.memory_space<vmem>>, %arg4: memref<1x32x8xbf16, #tpu.memory_space<vmem>>, %arg5: memref<1x1x8xf32, #tpu.memory_space<vmem>>, %arg6: memref<1x32x8xbf16, #tpu.memory_space<vmem>>, %arg7: memref<1x1x8xf32, #tpu.memory_space<vmem>>, %arg8: memref<1x32x8xbf16, #tpu.memory_space<vmem>>, %arg9: memref<1x1x8xf32, #tpu.memory_space<vmem>>, %arg10: memref<1x1x8x8xbf16, #tpu.memory_space<vmem>>, %arg11: memref<1x1x8x8xbf16, #tpu.memory_space<vmem>>, %arg12: memref<1x1x8x8xbf16, #tpu.memory_space<vmem>>) attributes {dimension_semantics = [#tpu.dimension_semantics<parallel>, #tpu.dimension_semantics<parallel>, #tpu.dimension_semantics<parallel>], iteration_bounds = array<i64: 2, 1, 4>, scalar_prefetch = 0 : i64, scratch_operands = 0 : i64, tpu.core_type = #tpu.core_type<tc>, window_params = [{transform_indices = @transform_0, window_bounds = array<i64: 1, 8, 32>}, {transform_indices = @transform_1, window_bounds = array<i64: 1, 32, 8>}, {transform_indices = @transform_2, window_bounds = array<i64: 1, 1, 8>}, {transform_indices = @transform_3, window_bounds = array<i64: 1, 32, 8>}, {transform_indices = @transform_4, window_bounds = array<i64: 1, 1, 8>}, {transform_indices = @transform_5, window_bounds = array<i64: 1, 32, 8>}, {transform_indices = @transform_6, window_bounds = array<i64: 1, 1, 8>}, {transform_indices = @transform_7, window_bounds = array<i64: 1, 1, 8, 8>}, {transform_indices = @transform_8, window_bounds = array<i64: 1, 1, 8, 8>}, {transform_indices = @transform_9, window_bounds = array<i64: 1, 1, 8, 8>}]} {
    %c0 = arith.constant 0 : index
    %c0_0 = arith.constant 0 : index
    %c0_1 = arith.constant 0 : index
    %0 = vector.load %arg3[%c0, %c0_0, %c0_1] : memref<1x8x32xbf16, #tpu.memory_space<vmem>>, vector<1x8x32xbf16>
    %1 = vector.shape_cast %0 : vector<1x8x32xbf16> to vector<8x32xbf16>
    %c0_2 = arith.constant 0 : index
    %c0_3 = arith.constant 0 : index
    %c0_4 = arith.constant 0 : index
    %2 = vector.load %arg4[%c0_2, %c0_3, %c0_4] : memref<1x32x8xbf16, #tpu.memory_space<vmem>>, vector<1x32x8xbf16>
    %3 = vector.shape_cast %2 : vector<1x32x8xbf16> to vector<32x8xbf16>
    %cst = arith.constant dense<0.000000e+00> : vector<8x8xf32>
    %4 = tpu.matmul %1, %3, %cst {dimension_numbers = #tpu.dot_dimension_numbers<[1], [0], [0], [1], [0, 0, 1, 1], [], []>} : vector<8x32xbf16>, vector<32x8xbf16>, vector<8x8xf32> -> vector<8x8xf32>
    %c0_5 = arith.constant 0 : index
    %c0_6 = arith.constant 0 : index
    %c0_7 = arith.constant 0 : index
    %5 = vector.load %arg5[%c0_5, %c0_6, %c0_7] : memref<1x1x8xf32, #tpu.memory_space<vmem>>, vector<1x1x8xf32>
    %6 = vector.shape_cast %5 : vector<1x1x8xf32> to vector<1x8xf32>
    %7 = vector.broadcast %6 : vector<1x8xf32> to vector<8x8xf32>
    %8 = arith.addf %4, %7 : vector<8x8xf32>
    %c0_8 = arith.constant 0 : index
    %c0_9 = arith.constant 0 : index
    %c0_10 = arith.constant 0 : index
    %9 = vector.load %arg6[%c0_8, %c0_9, %c0_10] : memref<1x32x8xbf16, #tpu.memory_space<vmem>>, vector<1x32x8xbf16>
    %10 = vector.shape_cast %9 : vector<1x32x8xbf16> to vector<32x8xbf16>
    %cst_11 = arith.constant dense<0.000000e+00> : vector<8x8xf32>
    %11 = tpu.matmul %1, %10, %cst_11 {dimension_numbers = #tpu.dot_dimension_numbers<[1], [0], [0], [1], [0, 0, 1, 1], [], []>} : vector<8x32xbf16>, vector<32x8xbf16>, vector<8x8xf32> -> vector<8x8xf32>
    %c0_12 = arith.constant 0 : index
    %c0_13 = arith.constant 0 : index
    %c0_14 = arith.constant 0 : index
    %12 = vector.load %arg7[%c0_12, %c0_13, %c0_14] : memref<1x1x8xf32, #tpu.memory_space<vmem>>, vector<1x1x8xf32>
    %13 = vector.shape_cast %12 : vector<1x1x8xf32> to vector<1x8xf32>
    %14 = vector.broadcast %13 : vector<1x8xf32> to vector<8x8xf32>
    %15 = arith.addf %11, %14 : vector<8x8xf32>
    %c0_15 = arith.constant 0 : index
    %c0_16 = arith.constant 0 : index
    %c0_17 = arith.constant 0 : index
    %16 = vector.load %arg8[%c0_15, %c0_16, %c0_17] : memref<1x32x8xbf16, #tpu.memory_space<vmem>>, vector<1x32x8xbf16>
    %17 = vector.shape_cast %16 : vector<1x32x8xbf16> to vector<32x8xbf16>
    %cst_18 = arith.constant dense<0.000000e+00> : vector<8x8xf32>
    %18 = tpu.matmul %1, %17, %cst_18 {dimension_numbers = #tpu.dot_dimension_numbers<[1], [0], [0], [1], [0, 0, 1, 1], [], []>} : vector<8x32xbf16>, vector<32x8xbf16>, vector<8x8xf32> -> vector<8x8xf32>
    %c0_19 = arith.constant 0 : index
    %c0_20 = arith.constant 0 : index
    %c0_21 = arith.constant 0 : index
    %19 = vector.load %arg9[%c0_19, %c0_20, %c0_21] : memref<1x1x8xf32, #tpu.memory_space<vmem>>, vector<1x1x8xf32>
    %20 = vector.shape_cast %19 : vector<1x1x8xf32> to vector<1x8xf32>
    %21 = vector.broadcast %20 : vector<1x8xf32> to vector<8x8xf32>
    %22 = arith.addf %18, %21 : vector<8x8xf32>
    %cst_22 = arith.constant 0.353553385 : f32
    %23 = vector.broadcast %cst_22 : f32 to vector<8x8xf32>
    %24 = arith.mulf %8, %23 : vector<8x8xf32>
    %25 = arith.truncf %24 : vector<8x8xf32> to vector<8x8xbf16>
    %c0_23 = arith.constant 0 : index
    %c0_24 = arith.constant 0 : index
    %c0_25 = arith.constant 0 : index
    %c0_26 = arith.constant 0 : index
    %26 = vector.load %arg10[%c0_23, %c0_24, %c0_25, %c0_26] : memref<1x1x8x8xbf16, #tpu.memory_space<vmem>>, vector<1x1x8x8xbf16>
    %27 = vector.shape_cast %26 : vector<1x1x8x8xbf16> to vector<8x8xbf16>
    %28 = vector.shape_cast %25 : vector<8x8xbf16> to vector<1x1x8x8xbf16>
    tpu.vector_store %arg10[%c0_23, %c0_24, %c0_25, %c0_26], %28 {strides = array<i32>} : memref<1x1x8x8xbf16, #tpu.memory_space<vmem>>, vector<1x1x8x8xbf16>,
    %29 = arith.truncf %15 : vector<8x8xf32> to vector<8x8xbf16>
    %c0_27 = arith.constant 0 : index
    %c0_28 = arith.constant 0 : index
    %c0_29 = arith.constant 0 : index
    %c0_30 = arith.constant 0 : index
    %30 = vector.load %arg11[%c0_27, %c0_28, %c0_29, %c0_30] : memref<1x1x8x8xbf16, #tpu.memory_space<vmem>>, vector<1x1x8x8xbf16>
    %31 = vector.shape_cast %30 : vector<1x1x8x8xbf16> to vector<8x8xbf16>
    %32 = vector.shape_cast %29 : vector<8x8xbf16> to vector<1x1x8x8xbf16>
    tpu.vector_store %arg11[%c0_27, %c0_28, %c0_29, %c0_30], %32 {strides = array<i32>} : memref<1x1x8x8xbf16, #tpu.memory_space<vmem>>, vector<1x1x8x8xbf16>,
    %33 = arith.truncf %22 : vector<8x8xf32> to vector<8x8xbf16>
    %c0_31 = arith.constant 0 : index
    %c0_32 = arith.constant 0 : index
    %c0_33 = arith.constant 0 : index
    %c0_34 = arith.constant 0 : index
    %34 = vector.load %arg12[%c0_31, %c0_32, %c0_33, %c0_34] : memref<1x1x8x8xbf16, #tpu.memory_space<vmem>>, vector<1x1x8x8xbf16>
    %35 = vector.shape_cast %34 : vector<1x1x8x8xbf16> to vector<8x8xbf16>
    %36 = vector.shape_cast %33 : vector<8x8xbf16> to vector<1x1x8x8xbf16>
    tpu.vector_store %arg12[%c0_31, %c0_32, %c0_33, %c0_34], %36 {strides = array<i32>} : memref<1x1x8x8xbf16, #tpu.memory_space<vmem>>, vector<1x1x8x8xbf16>,
    return
  }
  func.func @transform_0(%arg0: i32, %arg1: i32, %arg2: i32) -> (i32, i32, i32) {
    %c0_i32 = arith.constant 0 : i32
    %c0_i32_0 = arith.constant 0 : i32
    return %arg0, %arg1, %c0_i32 : i32, i32, i32
  }
  func.func @transform_1(%arg0: i32, %arg1: i32, %arg2: i32) -> (i32, i32, i32) {
    %c0_i32 = arith.constant 0 : i32
    %c0_i32_0 = arith.constant 0 : i32
    %c0_i32_1 = arith.constant 0 : i32
    return %arg2, %c0_i32, %c0_i32_0 : i32, i32, i32
  }
  func.func @transform_2(%arg0: i32, %arg1: i32, %arg2: i32) -> (i32, i32, i32) {
    %c0_i32 = arith.constant 0 : i32
    %c0_i32_0 = arith.constant 0 : i32
    %c0_i32_1 = arith.constant 0 : i32
    return %arg2, %c0_i32, %c0_i32_0 : i32, i32, i32
  }
  func.func @transform_3(%arg0: i32, %arg1: i32, %arg2: i32) -> (i32, i32, i32) {
    %c0_i32 = arith.constant 0 : i32
    %c0_i32_0 = arith.constant 0 : i32
    %c0_i32_1 = arith.constant 0 : i32
    return %arg2, %c0_i32, %c0_i32_0 : i32, i32, i32
  }
  func.func @transform_4(%arg0: i32, %arg1: i32, %arg2: i32) -> (i32, i32, i32) {
    %c0_i32 = arith.constant 0 : i32
    %c0_i32_0 = arith.constant 0 : i32
    %c0_i32_1 = arith.constant 0 : i32
    return %arg2, %c0_i32, %c0_i32_0 : i32, i32, i32
  }
  func.func @transform_5(%arg0: i32, %arg1: i32, %arg2: i32) -> (i32, i32, i32) {
    %c0_i32 = arith.constant 0 : i32
    %c0_i32_0 = arith.constant 0 : i32
    %c0_i32_1 = arith.constant 0 : i32
    return %arg2, %c0_i32, %c0_i32_0 : i32, i32, i32
  }
  func.func @transform_6(%arg0: i32, %arg1: i32, %arg2: i32) -> (i32, i32, i32) {
    %c0_i32 = arith.constant 0 : i32
    %c0_i32_0 = arith.constant 0 : i32
    %c0_i32_1 = arith.constant 0 : i32
    return %arg2, %c0_i32, %c0_i32_0 : i32, i32, i32
  }
  func.func @transform_7(%arg0: i32, %arg1: i32, %arg2: i32) -> (i32, i32, i32, i32) {
    %c0_i32 = arith.constant 0 : i32
    %c0_i32_0 = arith.constant 0 : i32
    return %arg0, %arg2, %arg1, %c0_i32 : i32, i32, i32, i32
  }
  func.func @transform_8(%arg0: i32, %arg1: i32, %arg2: i32) -> (i32, i32, i32, i32) {
    %c0_i32 = arith.constant 0 : i32
    %c0_i32_0 = arith.constant 0 : i32
    return %arg0, %arg2, %arg1, %c0_i32 : i32, i32, i32, i32
  }
  func.func @transform_9(%arg0: i32, %arg1: i32, %arg2: i32) -> (i32, i32, i32, i32) {
    %c0_i32 = arith.constant 0 : i32
    %c0_i32_0 = arith.constant 0 : i32
    return %arg0, %arg2, %arg1, %c0_i32 : i32, i32, i32, i32
  }
}

</mosaic_0001>

<bundles_post_ra>
// kernel: tpu_custom_call.1
= control target key start
LH: loop header
LB: loop body
LE: loop exit
PB: predicated region body
PF: predicated region fallthrough
CT: control target
= control target key end

     0   :  { %s2518_s0 = inlined_call_operand.hbm [shape: bf16[2,8,32], index: 0, kind: input, shape index: {}]   ;;  %s2519_s1 = inlined_call_operand.hbm [shape: bf16[4,32,8], index: 1, kind: input, shape index: {}]   ;;  %s2520_s2 = inlined_call_operand.hbm [shape: f32[4,1,8], index: 2, kind: input, shape index: {}]   ;;  %s2521_s3 = inlined_call_operand.hbm [shape: bf16[4,32,8], index: 3, kind: input, shape index: {}]   ;;  %s2522_s4 = inlined_call_operand.hbm [shape: f32[4,1,8], index: 4, kind: input, shape index: {}]   ;;  %s2523_s5 = inlined_call_operand.hbm [shape: bf16[4,32,8], index: 5, kind: input, shape index: {}]   ;;  %s2524_s6 = inlined_call_operand.hbm [shape: f32[4,1,8], index: 6, kind: input, shape index: {}]   ;;  %s2525_s7 = inlined_call_operand.hbm [shape: bf16[2,4,8,8], index: 7, kind: output, shape index: {0}]   ;;  %s2526_s8 = inlined_call_operand.hbm [shape: bf16[2,4,8,8], index: 8, kind: output, shape index: {1}]   ;;  %s2527_s9 = inlined_call_operand.hbm [shape: bf16[2,4,8,8], index: 9, kind: output, shape index: {2}]  }
   0x1   :  { %2559 = sst [smem:[#allocation39_spill]] %s2518_s0 }
   0x2   :  { %2560 = sst [smem:[#allocation40_spill]] %s2519_s1 }
   0x3   :  { %2561 = sst [smem:[#allocation41_spill]] %s2520_s2 }
   0x4   :  { %2562 = sst [smem:[#allocation42_spill]] %s2521_s3 }
   0x5   :  { %2563 = sst [smem:[#allocation43_spill]] %s2522_s4 }
   0x6   :  { %2564 = sst [smem:[#allocation44_spill]] %s2523_s5 }
   0x7   :  { %2565 = sst [smem:[#allocation45_spill]] %s2524_s6 }
   0x8   :  { %2566 = sst [smem:[#allocation46_spill]] %s2525_s7 }
   0x9   :  { %2567 = sst [smem:[#allocation47_spill]] %s2526_s8 }
   0xa   :  { %2568 = sst [smem:[#allocation48_spill]] %s2527_s9 }
   0xb   :  { %15 = vsyncpa [#allocation3], 0 }
   0xc   :  { %17 = vsyncpa [#allocation3 + $0x1], 0 }
   0xd   :  { %18 = vsyncpa [#allocation6], 0 }
   0xe   :  { %20 = vsyncpa [#allocation6 + $0x1], 0 }
   0xf   :  { %21 = vsyncpa [#allocation9], 0 }
  0x10   :  { %23 = vsyncpa [#allocation9 + $0x1], 0 }
  0x11   :  { %24 = vsyncpa [#allocation12], 0 }
  0x12   :  { %26 = vsyncpa [#allocation12 + $0x1], 0 }
  0x13   :  { %27 = vsyncpa [#allocation4], 0 }
  0x14   :  { %29 = vsyncpa [#allocation4 + $0x1], 0 }
  0x15   :  { %30 = vsyncpa [#allocation16], 0 }
  0x16   :  { %32 = vsyncpa [#allocation16 + $0x1], 0  ;;  %s1905_s30 = smov 0   ;;  %s1907_s10 = smov 0  }
  0x17   :  { %s1909_s11 = smov 0   ;;  %s1911_s12 = smov 0  }
  0x18   :  { %s1913_s13 = smov 0   ;;  %s1915_s14 = smov 0  }
  0x19   :  { %s1917_s15 = smov 0   ;;  %s1919_s16 = smov 0  }
  0x1a   :  { %s1921_s17 = smov 0   ;;  %s1923_s18 = smov 0  }
  0x1b   :  { %s1925_s19 = smov 0   ;;  %s1927_s20 = smov 0  }
  0x1c   :  { %s1929_s21 = smov 0   ;;  %s1931_s22 = smov 0  }
  0x1d LB: > { %2569 = sst [smem:[#allocation24_spill]] %s1795_s11  ;;  %p2536_p0 = scmp.eq.s32.totalorder %s1839_s22, 0  ;;  %s1839_s22 = sphi %s1931_s22, %s38_s22   ;;  %s1835_s21 = sphi %s1929_s21, %s2639_s21   ;;  %s1831_s20 = sphi %s1927_s20, %s2638_s20   ;;  %s1827_s19 = sphi %s1925_s19, %s2637_s19   ;;  %s1823_s18 = sphi %s1923_s18, %s2636_s18   ;;  %s1819_s17 = sphi %s1921_s17, %s2635_s17   ;;  %s1815_s16 = sphi %s1919_s16, %s2645_s16   ;;  %s1811_s15 = sphi %s1917_s15, %s2644_s15   ;;  %s1807_s14 = sphi %s1915_s14, %s2633_s14   ;;  %s1803_s13 = sphi %s1913_s13, %s2643_s13   ;;  %s1799_s12 = sphi %s1911_s12, %s2642_s12   ;;  %s1795_s11 = sphi %s1909_s11, %s2631_s11   ;;  %s1791_s10 = sphi %s1907_s10, %s2641_s10   ;;  %s1787_s30 = sphi %s1905_s30, %s2640_s30  }
  0x1e   : > { %2570 = sst [smem:[#allocation25_spill]] %s1807_s14  ;;  %p99_p1 = scmp.ne.s32.totalorder %s1807_s14, %s1803_s13 }
  0x1f   : > { %2571 = sst [smem:[#allocation26_spill]] %s1819_s17  ;;  %p2535_p2 = scmp.lt.s32.totalorder %s1839_s22, 8 }
  0x20   : > { %2572 = sst [smem:[#allocation27_spill]] %s1823_s18  ;;  %p101_p3 = por %p99_p1, %p2536_p0 }
  0x21   : > { %2573 = sst [smem:[#allocation28_spill]] %s1827_s19  ;;  %s1982_s23 = sand.u32 1, %s1839_s22  }
  0x22   : > { %2574 = sst [smem:[#allocation29_spill]] %s1831_s20  ;;  %s1985_s24 = sand.u32 1, %s1807_s14  }
  0x23   : > { %2575 = sst [smem:[#allocation30_spill]] %s1835_s21  ;;  %s1988_s25 = sshll.u32 %s1985_s24, 4 }
  0x24   : > { %2576 = sst [smem:[#allocation31_spill]] %s1985_s24  ;;  %s1991_s26 = sshll.u32 %s1831_s20, 8 }
  0x25   : > { %s2577_s1 = sld [smem:[#allocation40_spill]]  ;;  %s372_s9 = scalar_lea.vmem [#allocation5], %s1988_s25 }
  0x26   : > { %s379_s7 = sshll.u32 %s372_s9, 4  ;;  %p2002_p4 = pnand %p2535_p2, %p101_p3  ;;  %s2006_s7 = int_to_ptr.vmem [resolvable:$true] %s379_s7 }
  0x28   : > { %s2578_s8 = scalar_select %p2002_p4, 1, 0 }
  0x29   : > { %p2013_p6 = pneg %p2002_p4 }
  0x2b   : > { %s1997_s29 = scalar_lea.hbm %s2577_s1, %s1991_s26  ;;  %s1416_s6 = scalar_lea.hbm %s2577_s1, 1024 }
  0x2c   : > { %s1411_s19 = scalar_lea.hbm %s1997_s29, 256  ;;  %p1417_p9 = scmp.lt.u32.totalorder %s1997_s29, %s2577_s1 }
  0x2d   : > { %p1412_p5 = scmp.ne.s32.totalorder %s1997_s29, %s1411_s19  ;;  %p1418_p10 = scmp.lt.u32.totalorder %s1416_s6, %s1411_s19 }
  0x2e   : > { %p1420_p12 = scmp.lt.u32.totalorder %s1411_s19, %s1997_s29 }
  0x2f   : > { %p1414_p7 = pnand %p2013_p6, %p1412_p5  ;;  %p1419_p11 = por %p1418_p10, %p1417_p9 }
  0x31   : > { %p1415_p8 = pneg %p1414_p7  ;;  %p1421_p13 = por %p1420_p12, %p1419_p11 }
  0x33   : > { %p1422_p1 = pnand %p1421_p13, %p1415_p8 }
  0x35   : > { %1425 = shalt.err (!%p1422_p1)
}
  0x36   : > { %s1426_s18 = scalar_lea.vmem %s2006_s7, 256  ;;  %s1841_s9 = smov [#allocation5]  }
  0x37   : > { %p1427_p3 = scmp.ne.s32.totalorder %s2006_s7, %s1426_s18  ;;  %s1431_s28 = sshll.u32 %s1841_s9, 4  ;;  %s1432_s28 = int_to_ptr.vmem [resolvable:$false] %s1431_s28 }
  0x38   : > { %s1433_s4 = scalar_lea.vmem %s1432_s28, 512  ;;  %p1434_p2 = scmp.lt.s32.totalorder %s2006_s7, %s1432_s28 }
  0x39   : > { %p1429_p5 = pnand %p1427_p3, %p2013_p6  ;;  %p1435_p0 = scmp.lt.s32.totalorder %s1433_s4, %s1426_s18 }
  0x3b   : > { %p1430_p7 = pneg %p1429_p5  ;;  %p1436_p9 = por %p1435_p0, %p1434_p2 }
  0x3d   : > { %p1437_p10 = pnand %p1436_p9, %p1430_p7 }
  0x3f   : > { %1440 = shalt.err (!%p1437_p10)
}
  0x40   : > { %s2538_s6 = smov 64   ;;  %s2540_s19 = smov 4  }
  0x41   : > { %s2580_s18 = scalar_lea.sflag [#allocation6], %s1982_s23  ;;  %p1168_p0 = scmp.ge.s32.totalorder %s1839_s22, 1 }
  0x42   : > { %1261 = dma.hbm_to_vmem [thread:$0]  (!%p2002_p4), %s1997_s29, 256, %s2006_s7, %s2580_s18, %s2538_s6, %s2538_s6, %s2540_s19  }
  0x43   : > { %p480_p2 = scmp.lt.s32.totalorder %s1839_s22, 9  ;;  %s2583_s3 = sld [smem:[#allocation42_spill]] }
  0x44   : > { %s410_s1 = scalar_lea.vmem [#allocation8], %s1988_s25  ;;  %s2544_s7 = scalar_lea.sflag [#allocation9], %s1982_s23 }
  0x45   : > { %p2043_p8 = pnand %p1168_p0, %p480_p2  ;;  %s417_s2 = sshll.u32 %s410_s1, 4  ;;  %s2054_s2 = int_to_ptr.vmem [resolvable:$true] %s417_s2 }
  0x47   : > { %s2581_s24 = scalar_select %p2043_p8, 1, 0 }
  0x49   : > { %2582 = sst [smem:[#allocation32_spill]] %s2581_s24  ;;  %s2051_s4 = scalar_lea.hbm %s2583_s3, %s1991_s26 }
  0x4a   : > { %s1441_s29 = scalar_lea.hbm %s2051_s4, 256  ;;  %s1446_s9 = scalar_lea.hbm %s2583_s3, 1024 }
  0x4b   : > { %p1442_p11 = scmp.ne.s32.totalorder %s2051_s4, %s1441_s29  ;;  %p1447_p1 = scmp.lt.u32.totalorder %s2051_s4, %s2583_s3 }
  0x4c   : > { %p1448_p3 = scmp.lt.u32.totalorder %s1446_s9, %s1441_s29  ;;  %p1450_p7 = scmp.lt.u32.totalorder %s1441_s29, %s2051_s4 }
  0x4d   : > { %p1444_p12 = pnand %p1442_p11, %p2013_p6 }
  0x4e   : > { %p1449_p5 = por %p1448_p3, %p1447_p1 }
  0x4f   : > { %p1445_p13 = pneg %p1444_p12 }
  0x50   : > { %p1451_p9 = por %p1450_p7, %p1449_p5 }
  0x52   : > { %p1452_p10 = pnand %p1451_p9, %p1445_p13 }
  0x54   : > { %1455 = shalt.err (!%p1452_p10)
}
  0x55   : > { %s1456_s1 = scalar_lea.vmem %s2054_s2, 256  ;;  %s1844_s6 = smov [#allocation8]  }
  0x56   : > { %p1457_p0 = scmp.ne.s32.totalorder %s2054_s2, %s1456_s1  ;;  %s1461_s18 = sshll.u32 %s1844_s6, 4  ;;  %s1462_s18 = int_to_ptr.vmem [resolvable:$false] %s1461_s18 }
  0x57   : > { %s1463_s19 = scalar_lea.vmem %s1462_s18, 512  ;;  %p1464_p12 = scmp.lt.s32.totalorder %s2054_s2, %s1462_s18 }
  0x58   : > { %p1459_p2 = pnand %p1457_p0, %p2013_p6  ;;  %p1465_p8 = scmp.lt.s32.totalorder %s1463_s19, %s1456_s1 }
  0x5a   : > { %p1460_p11 = pneg %p1459_p2  ;;  %p1466_p1 = por %p1465_p8, %p1464_p12 }
  0x5c   : > { %p1467_p3 = pnand %p1466_p1, %p1460_p11 }
  0x5e   : > { %1470 = shalt.err (!%p1467_p3)
}
  0x5f   : > { %s2584_s29 = smov 4   ;;  %s2585_s9 = smov 64  }
  0x60   : > { %1267 = dma.hbm_to_vmem [thread:$0]  (!%p2002_p4), %s2051_s4, 256, %s2054_s2, %s2544_s7, %s2585_s9, %s2585_s9, %s2584_s29  }
  0x61   : > { %s2586_s5 = sld [smem:[#allocation44_spill]]  ;;  %s448_s18 = scalar_lea.vmem [#allocation11], %s1988_s25 }
  0x62   : > { %s455_s19 = sshll.u32 %s448_s18, 4  ;;  %s2543_s3 = scalar_lea.sflag [#allocation12], %s1982_s23  ;;  %s2090_s19 = int_to_ptr.vmem [resolvable:$true] %s455_s19 }
  0x67   : > { %s2087_s1 = scalar_lea.hbm %s2586_s5, %s1991_s26  ;;  %s1476_s28 = scalar_lea.hbm %s2586_s5, 1024 }
  0x68   : > { %s1471_s24 = scalar_lea.hbm %s2087_s1, 256  ;;  %p1477_p7 = scmp.lt.u32.totalorder %s2087_s1, %s2586_s5 }
  0x69   : > { %p1472_p8 = scmp.ne.s32.totalorder %s2087_s1, %s1471_s24  ;;  %p1478_p9 = scmp.lt.u32.totalorder %s1476_s28, %s1471_s24 }
  0x6a   : > { %p1480_p0 = scmp.lt.u32.totalorder %s1471_s24, %s2087_s1 }
  0x6b   : > { %p1474_p13 = pnand %p1472_p8, %p2013_p6  ;;  %p1479_p10 = por %p1478_p9, %p1477_p7 }
  0x6d   : > { %p1475_p5 = pneg %p1474_p13  ;;  %p1481_p2 = por %p1480_p0, %p1479_p10 }
  0x6f   : > { %p1482_p11 = pnand %p1481_p2, %p1475_p5 }
  0x71   : > { %1485 = shalt.err (!%p1482_p11)
}
  0x72   : > { %s1486_s25 = scalar_lea.vmem %s2090_s19, 256  ;;  %s1845_s18 = smov [#allocation11]  }
  0x73   : > { %p1487_p12 = scmp.ne.s32.totalorder %s2090_s19, %s1486_s25  ;;  %s1491_s2 = sshll.u32 %s1845_s18, 4  ;;  %s1492_s2 = int_to_ptr.vmem [resolvable:$false] %s1491_s2 }
  0x74   : > { %s1493_s4 = scalar_lea.vmem %s1492_s2, 512  ;;  %p1494_p8 = scmp.lt.s32.totalorder %s2090_s19, %s1492_s2 }
  0x75   : > { %p1489_p1 = pnand %p1487_p12, %p2013_p6  ;;  %p1495_p13 = scmp.lt.s32.totalorder %s1493_s4, %s1486_s25 }
  0x77   : > { %p1490_p3 = pneg %p1489_p1  ;;  %p1496_p7 = por %p1495_p13, %p1494_p8 }
  0x79   : > { %p1497_p9 = pnand %p1496_p7, %p1490_p3 }
  0x7b   : > { %1500 = shalt.err (!%p1497_p9)
}
  0x7c   : > { %1273 = dma.hbm_to_vmem [thread:$0]  (!%p2002_p4), %s2087_s1, 256, %s2090_s19, %s2543_s3, %s2585_s9, %s2585_s9, %s2584_s29  }
  0x7d   : > { %s2120_s24 = sadd.s32 4294967295, %s1839_s22   ;;  %s50_s26 = sadd.s32 1, %s1831_s20 }
  0x7e   : > { %p51_p5 = scmp.ge.s32.totalorder %s50_s26, 4  ;;  %s57_s6 = sadd.s32 1, %s1835_s21 }
  0x7f   : > { %s66_s25 = sadd.s32 1, %s1819_s17  ;;  %p73_p10 = scmp.ne.s32.totalorder %s1819_s17, %s1815_s16 }
  0x80   : > { %s2647_s26 = smov (%p51_p5, %s50_s26), 0  ;;  %s2649_s6 = smov (!%p51_p5, %s57_s6), %s1835_s21 }
  0x81   : > { %2587 = sst [smem:[#allocation33_spill]] %s2647_s26  ;;  %p2588_p0 = scmp.eq.s32.totalorder %s1839_s22, 0 }
  0x82   : > { %p79_p11 = scmp.ne.s32.totalorder %s1815_s16, %s1811_s15  ;;  %p59_p12 = scmp.ge.s32.totalorder %s2649_s6, 2 }
  0x83   : > { %p2133_p2 = por %p2588_p0, %p73_p10  ;;  %p80_p1 = scmp.eq.s32.totalorder %s2120_s24, 0 }
  0x84   : > { %s89_s9 = ssub.s32 %s1831_s20, %s2647_s26  ;;  %s92_s1 = sadd.s32 1, %s1807_s14 }
  0x85   : > { %s2651_s6 = smov (%p59_p12, %s2649_s6), 0  ;;  %p2145_p3 = por %p80_p1, %p79_p11 }
  0x86   : > { %2590 = sst [smem:[#allocation34_spill]] %s2651_s6  ;;  %p90_p8 = scmp.eq.s32.totalorder %s89_s9, 0 }
  0x87   : > { %s2591_s19 = scalar_select %p2145_p3, 1, 0 }
  0x88   : > { %s61_s15 = ssub.s32 %s1835_s21, %s2651_s6  ;;  %p105_p13 = scmp.ne.s32.totalorder %s1803_s13, %s1799_s12 }
  0x89   : > { %p64_p7 = scmp.eq.s32.totalorder %s61_s15, 0  ;;  %s247_s18 = sor.u32 %s89_s9, %s61_s15 }
  0x8a   : > { %s2154_s2 = scalar_select %p90_p8, %s1807_s14, %s92_s1  }
  0x8b   : > { %s2157_s4 = scalar_select %p64_p7, %s1819_s17, %s66_s25  }
  0x8c   : > { %2592 = sst [smem:[#allocation35_spill]] %s2154_s2  ;;  %p2159_p9 = por %p105_p13, %p80_p1 }
  0x8d   : > { %2593 = sst [smem:[#allocation36_spill]] %s2157_s4  ;;  %p250_p5 = scmp.eq.s32.totalorder %s247_s18, 0 }
  0x8e   : > { %s2594_s3 = scalar_select %p2159_p9, 1, 0 }
  0x8f   : > { %s252_s7 = sadd.s32 1, %s1795_s11  ;;  %p262_p10 = scmp.ne.s32.totalorder %s1795_s11, %s1791_s10 }
  0x90   : > { %s2167_s28 = scalar_select %p250_p5, %s1795_s11, %s252_s7  }
  0x91   : > { %p263_p0 = scmp.eq.s32.totalorder %s2120_s24, 7  ;;  %p268_p11 = scmp.ne.s32.totalorder %s1791_s10, %s1787_s30 }
  0x92   : > { %2595 = sst [smem:[#allocation37_spill]] %s2167_s28  ;;  %s2596_s12 = sadd.s32 4294967294, %s1839_s22  }
  0x93   : > { %p269_p12 = scmp.eq.s32.totalorder %s2596_s12, 7  ;;  %s349_s9 = sand.u32 1, %s1819_s17  }
  0x94   : > { %p2175_p8 = por %p263_p0, %p262_p10  ;;  %s1154_s15 = sshll.u32 %s349_s9, 2 }
  0x95   : > { %p2179_p1 = por %p269_p12, %p268_p11  ;;  %s1155_s18 = sshll.u32 %s1835_s21, 6 }
  0x96   : > { %s2597_s25 = scalar_select %p2175_p8, 1, 0 }
  0x97   : > { %s2598_s1 = scalar_select %p2179_p1, 1, 0 }
  0x98   : > { %s2600_s0 = sld [smem:[#allocation39_spill]]  ;;  %s353_s12 = scalar_lea.vmem [#allocation2], %s1154_s15 }
  0x99   : > { %2599 = sst [smem:[#allocation38_spill]] %s2598_s1  ;;  %s361_s26 = sshll.u32 %s353_s12, 4  ;;  %s2189_s26 = int_to_ptr.vmem [resolvable:$true] %s361_s26 }
  0x9a   : > { %p2601_p13 = scmp.lt.s32.totalorder %s1839_s22, 8  ;;  %s2200_s21 = sshll.u32 %s1831_s20, 4 }
  0x9b   : > { %s350_s15 = scalar_lea.sflag [#allocation3], %s349_s9 }
  0x9c   : > { %p2195_p7 = pnand %p2601_p13, %p2133_p2 }
  0x9e   : > { %s2187_s7 = scalar_lea.hbm %s2600_s0, %s1155_s18  ;;  %s2603_s18 = sld [smem:[#allocation41_spill]] }
  0x9f   : > { %s1501_s12 = scalar_lea.hbm %s2187_s7, 64  ;;  %p1503_p10 = pneg %p2195_p7 }
  0xa0   : > { %p1502_p5 = scmp.ne.s32.totalorder %s2187_s7, %s1501_s12  ;;  %s1506_s20 = scalar_lea.hbm %s2600_s0, 128 }
  0xa1   : > { %p1507_p11 = scmp.lt.u32.totalorder %s2187_s7, %s2600_s0  ;;  %p1508_p12 = scmp.lt.u32.totalorder %s1506_s20, %s1501_s12 }
  0xa2   : > { %p1504_p2 = pnand %p1503_p10, %p1502_p5  ;;  %p1510_p1 = scmp.lt.u32.totalorder %s1501_s12, %s2187_s7 }
  0xa3   : > { %p1509_p13 = por %p1508_p12, %p1507_p11 }
  0xa4   : > { %s2604_s2 = smov %s2603_s18  ;;  %s2206_s17 = scalar_lea.hbm %s2603_s18, %s2200_s21 }
  0xa5   : > { %p1505_p0 = pneg %p1504_p2  ;;  %p1511_p8 = por %p1510_p1, %p1509_p13 }
  0xa7   : > { %p1512_p9 = pnand %p1511_p8, %p1505_p0 }
  0xa9   : > { %1515 = shalt.err (!%p1512_p9)
}
  0xaa   : > { %s1516_s9 = scalar_lea.vmem %s2189_s26, 64  ;;  %s1846_s14 = smov [#allocation2]  }
  0xab   : > { %p1517_p5 = scmp.ne.s32.totalorder %s2189_s26, %s1516_s9  ;;  %s1521_s5 = sshll.u32 %s1846_s14, 4  ;;  %s1522_s5 = int_to_ptr.vmem [resolvable:$false] %s1521_s5 }
  0xac   : > { %s1523_s11 = scalar_lea.vmem %s1522_s5, 128  ;;  %p1524_p4 = scmp.lt.s32.totalorder %s2189_s26, %s1522_s5 }
  0xad   : > { %p1519_p2 = pnand %p1517_p5, %p1503_p10  ;;  %p1525_p11 = scmp.lt.s32.totalorder %s1523_s11, %s1516_s9 }
  0xaf   : > { %p1520_p3 = pneg %p1519_p2  ;;  %p1526_p12 = por %p1525_p11, %p1524_p4 }
  0xb1   : > { %p1527_p1 = pnand %p1526_p12, %p1520_p3 }
  0xb3   : > { %1530 = shalt.err (!%p1527_p1)
}
  0xb4   : > { %s2605_s20 = sld [smem:[#allocation31_spill]]  ;;  %s2606_s29 = sld [smem:[#allocation43_spill]] }
  0xb5   : > { %1258 = dma.hbm_to_vmem [thread:$0]  (!%p2195_p7), %s2187_s7, 64, %s2189_s26, %s350_s15  }
  0xb6   : > { %s1531_s14 = scalar_lea.hbm %s2206_s17, 16  ;;  %s1536_s11 = scalar_lea.hbm %s2604_s2, 64 }
  0xb7   : > { %p1532_p4 = scmp.ne.s32.totalorder %s2206_s17, %s1531_s14  ;;  %p1537_p8 = scmp.lt.u32.totalorder %s2206_s17, %s2604_s2 }
  0xb8   : > { %p1538_p7 = scmp.lt.u32.totalorder %s1536_s11, %s1531_s14  ;;  %p1540_p0 = scmp.lt.u32.totalorder %s1531_s14, %s2206_s17 }
  0xb9   : > { %p1534_p3 = pnand %p1532_p4, %p2013_p6 }
  0xba   : > { %s392_s28 = scalar_lea.vmem [#allocation7], %s2605_s20  ;;  %s2238_s9 = scalar_lea.hbm %s2606_s29, %s2200_s21 }
  0xbb   : > { %s399_s6 = sshll.u32 %s392_s28, 4  ;;  %p1535_p9 = pneg %p1534_p3  ;;  %s400_s6 = int_to_ptr.vmem [resolvable:$true] %s399_s6 }
  0xbc   : > { %p1539_p10 = por %p1538_p7, %p1537_p8 }
  0xbe   : > { %p1541_p13 = por %p1540_p0, %p1539_p10 }
  0xc0   : > { %p1542_p5 = pnand %p1541_p13, %p1535_p9 }
  0xc2   : > { %1545 = shalt.err (!%p1542_p5)
}
  0xc3   : > { %s1546_s26 = scalar_lea.vmem %s400_s6, 16  ;;  %s1847_s7 = smov [#allocation7]  }
  0xc4   : > { %p1547_p2 = scmp.ne.s32.totalorder %s400_s6, %s1546_s26  ;;  %s1551_s15 = sshll.u32 %s1847_s7, 4  ;;  %s1552_s15 = int_to_ptr.vmem [resolvable:$false] %s1551_s15 }
  0xc5   : > { %s1553_s28 = scalar_lea.vmem %s1552_s15, 32  ;;  %p1554_p1 = scmp.lt.s32.totalorder %s400_s6, %s1552_s15 }
  0xc6   : > { %p1549_p11 = pnand %p1547_p2, %p2013_p6  ;;  %p1555_p4 = scmp.lt.s32.totalorder %s1553_s28, %s1546_s26 }
  0xc8   : > { %p1550_p12 = pneg %p1549_p11  ;;  %p1556_p3 = por %p1555_p4, %p1554_p1 }
  0xca   : > { %p1557_p7 = pnand %p1556_p3, %p1550_p12 }
  0xcc   : > { %1560 = shalt.err (!%p1557_p7)
}
  0xcd   : > { %p2607_p8 = scmp.ne.s32.totalorder %s2578_s8, 0  ;;  %s2608_s0 = scalar_lea.sflag [#allocation6], %s1982_s23 }
  0xce   : > { %s430_s1 = scalar_lea.vmem [#allocation10], %s2605_s20  ;;  %s2609_s4 = sld [smem:[#allocation45_spill]] }
  0xcf   : > { %1264 = dma.hbm_to_vmem [thread:$0]  (!%p2607_p8), %s2206_s17, 16, %s400_s6, %s2608_s0  }
  0xd0   : > { %s437_s18 = sshll.u32 %s430_s1, 4  ;;  %s1561_s11 = scalar_lea.hbm %s2238_s9, 16  ;;  %s438_s18 = int_to_ptr.vmem [resolvable:$true] %s437_s18 }
  0xd1   : > { %p1562_p9 = scmp.ne.s32.totalorder %s2238_s9, %s1561_s11  ;;  %s1566_s15 = scalar_lea.hbm %s2606_s29, 64 }
  0xd2   : > { %p1567_p13 = scmp.lt.u32.totalorder %s2238_s9, %s2606_s29  ;;  %p1568_p5 = scmp.lt.u32.totalorder %s1566_s15, %s1561_s11 }
  0xd3   : > { %p1564_p10 = pnand %p1562_p9, %p2013_p6  ;;  %p1570_p11 = scmp.lt.u32.totalorder %s1561_s11, %s2238_s9 }
  0xd4   : > { %s2264_s5 = scalar_lea.hbm %s2609_s4, %s2200_s21  ;;  %p1569_p2 = por %p1568_p5, %p1567_p13 }
  0xd5   : > { %p1565_p0 = pneg %p1564_p10 }
  0xd6   : > { %p1571_p12 = por %p1570_p11, %p1569_p2 }
  0xd8   : > { %p1572_p1 = pnand %p1571_p12, %p1565_p0 }
  0xda   : > { %1575 = shalt.err (!%p1572_p1)
}
  0xdb   : > { %s1576_s17 = scalar_lea.vmem %s438_s18, 16  ;;  %s1848_s21 = smov [#allocation10]  }
  0xdc   : > { %p1577_p4 = scmp.ne.s32.totalorder %s438_s18, %s1576_s17  ;;  %s1581_s6 = sshll.u32 %s1848_s21, 4  ;;  %s1582_s6 = int_to_ptr.vmem [resolvable:$false] %s1581_s6 }
  0xdd   : > { %s1583_s0 = scalar_lea.vmem %s1582_s6, 32  ;;  %p1584_p9 = scmp.lt.s32.totalorder %s438_s18, %s1582_s6 }
  0xde   : > { %p1579_p3 = pnand %p1577_p4, %p2013_p6  ;;  %p1585_p10 = scmp.lt.s32.totalorder %s1583_s0, %s1576_s17 }
  0xe0   : > { %p1580_p7 = pneg %p1579_p3  ;;  %p1586_p8 = por %p1585_p10, %p1584_p9 }
  0xe2   : > { %p1587_p5 = pnand %p1586_p8, %p1580_p7 }
  0xe4   : > { %1590 = shalt.err (!%p1587_p5)
}
  0xe5   : > { %p2610_p13 = scmp.ne.s32.totalorder %s2578_s8, 0  ;;  %s2611_s2 = scalar_lea.sflag [#allocation9], %s1982_s23 }
  0xe6   : > { %s468_s1 = scalar_lea.vmem [#allocation13], %s2605_s20  ;;  %s1591_s14 = scalar_lea.hbm %s2264_s5, 16 }
  0xe7   : > { %1270 = dma.hbm_to_vmem [thread:$0]  (!%p2610_p13), %s2238_s9, 16, %s438_s18, %s2611_s2  }
  0xe8   : > { %s475_s12 = sshll.u32 %s468_s1, 4  ;;  %p1592_p0 = scmp.ne.s32.totalorder %s2264_s5, %s1591_s14  ;;  %s476_s12 = int_to_ptr.vmem [resolvable:$true] %s475_s12 }
  0xe9   : > { %s1596_s7 = scalar_lea.hbm %s2609_s4, 64  ;;  %p1597_p11 = scmp.lt.u32.totalorder %s2264_s5, %s2609_s4 }
  0xea   : > { %p1594_p8 = pnand %p1592_p0, %p2013_p6  ;;  %p1598_p12 = scmp.lt.u32.totalorder %s1596_s7, %s1591_s14 }
  0xeb   : > { %p1600_p4 = scmp.lt.u32.totalorder %s1591_s14, %s2264_s5 }
  0xec   : > { %p1595_p2 = pneg %p1594_p8  ;;  %p1599_p1 = por %p1598_p12, %p1597_p11 }
  0xee   : > { %p1601_p3 = por %p1600_p4, %p1599_p1 }
  0xf0   : > { %p1602_p7 = pnand %p1601_p3, %p1595_p2 }
  0xf2   : > { %1605 = shalt.err (!%p1602_p7)
}
  0xf3   : > { %s1606_s20 = scalar_lea.vmem %s476_s12, 16  ;;  %s1849_s9 = smov [#allocation13]  }
  0xf4   : > { %p1607_p9 = scmp.ne.s32.totalorder %s476_s12, %s1606_s20  ;;  %s1611_s18 = sshll.u32 %s1849_s9, 4  ;;  %s1612_s18 = int_to_ptr.vmem [resolvable:$false] %s1611_s18 }
  0xf5   : > { %s1613_s17 = scalar_lea.vmem %s1612_s18, 32  ;;  %p1614_p0 = scmp.lt.s32.totalorder %s476_s12, %s1612_s18 }
  0xf6   : > { %p1609_p10 = pnand %p1607_p9, %p2013_p6  ;;  %p1615_p8 = scmp.lt.s32.totalorder %s1613_s17, %s1606_s20 }
  0xf8   : > { %p1610_p5 = pneg %p1609_p10  ;;  %p1616_p13 = por %p1615_p8, %p1614_p0 }
  0xfa   : > { %p1617_p11 = pnand %p1616_p13, %p1610_p5 }
  0xfc   : > { %1620 = shalt.err (!%p1617_p11)
}
  0xfd   : > { %p2612_p12 = scmp.ne.s32.totalorder %s2578_s8, 0  ;;  %s2613_s21 = scalar_lea.sflag [#allocation12], %s1982_s23 }
  0xfe   : > { %s2614_s6 = sld [smem:[#allocation32_spill]] }
  0xff   : > { %1276 = dma.hbm_to_vmem [thread:$0]  (!%p2612_p12), %s2264_s5, 16, %s476_s12, %s2613_s21  }
 0x104   : > { %p2615_p2 = scmp.ne.s32.totalorder %s2614_s6, 0 }
 0x105   : > { %s486_s27 = sand.u32 (!%p2615_p2), 1, %s1815_s16   ;;  %p2616_p6 = scmp.ne.s32.totalorder (!%p2615_p2), %s2591_s19, 0 }
 0x106   : > { %484 = sbr.rel (%p2615_p2) target bundleno = 571 (0x23b), region = 48  ;;  %s2308_s0 = sshll.u32 (!%p2615_p2), %s486_s27, 2 }
 0x107   : > { %s487_s2 = scalar_lea.sflag (!%p2615_p2), [#allocation3], %s486_s27  ;;  %s490_s1 = scalar_lea.vmem (!%p2615_p2), [#allocation2], %s2308_s0 }
 0x10d   : > { %1762 = dma.done.wait (%p2616_p6), %s487_s2, 64  }
 0x10e   : > { %1764 = vsyncadd (%p2616_p6), %s487_s2, 4294967232  ;;  %s2316_s8 = sand.u32 1, %s2120_s24   ;;  %s2319_s23 = sand.u32 1, %s1803_s13  }
 0x10f   : > { %s2322_s5 = sshll.u32 %s2319_s23, 4  ;;  %s496_s12 = scalar_lea.sflag [#allocation6], %s2316_s8 }
 0x110   : > { %s499_s14 = scalar_lea.vmem [#allocation5], %s2322_s5  ;;  %p2617_p13 = scmp.ne.s32.totalorder %s2594_s3, 0 }
 0x112   : > { %1766 = dma.done.wait (%p2617_p13), %s496_s12, 272  }
 0x113   : > { %1768 = vsyncadd (%p2617_p13), %s496_s12, 4294967024  ;;  %s507_s24 = scalar_lea.vmem [#allocation7], %s2319_s23  ;;  %s513_s19 = scalar_lea.sflag [#allocation9], %s2316_s8 }
 0x114   : > { %s516_s11 = scalar_lea.vmem [#allocation8], %s2322_s5 }
 0x115   : > { %1770 = dma.done.wait (%p2617_p13), %s513_s19, 272  }
 0x116   : > { %1772 = vsyncadd (%p2617_p13), %s513_s19, 4294967024  ;;  %s524_s26 = scalar_lea.vmem [#allocation10], %s2319_s23  ;;  %s530_s7 = scalar_lea.sflag [#allocation12], %s2316_s8 }
 0x117   : > { %s533_s15 = scalar_lea.vmem [#allocation11], %s2322_s5 }
 0x118   : > { %1774 = dma.done.wait (%p2617_p13), %s530_s7, 272  }
 0x119   : > { %1776 = vsyncadd (%p2617_p13), %s530_s7, 4294967024  ;;  %v1850_v0 = vmov 0.0   ;;  %vm1851_vm0 = vmmov 0   ;;  %v1405_v1 = vld [vmem:[%s499_s14] sm:$0xff]   ;;  %v1406_v2 = vld [vmem:[%s499_s14 + $0x8] sm:$0xff]   ;;  %s2618_s3 = sld [smem:[#allocation28_spill]] }
 0x11a   : > { %1211 = vmatprep.subr.bf16.mxu0 %v1850_v0  ;;  %1219 = vmatprep.subr.bf16.mxu1 %v1850_v0  ;;  %v1407_v3 = vld [vmem:[%s516_s11] sm:$0xff]   ;;  %v1409_v4 = vld [vmem:[%s516_s11 + $0x8] sm:$0xff]   ;;  %vm638_vm1 = vcmask 261120   ;;  %s2619_s28 = sld [smem:[#allocation27_spill]]  ;;  %s596_s20 = sand.u32 1, %s1791_s10   ;;  %vm810_vm2 = vcmask 60416  }
 0x11b   : > { %1215 = vmatprep.mubr.msk.bf16.mxu0 %vm1851_vm0, %v1850_v0  ;;  %1223 = vmatprep.mubr.msk.bf16.mxu1 %vm1851_vm0, %v1850_v0  ;;  %v614_v5 = vld [vmem:[%s490_s1] sm:$0xf]  ;;  %v1408_v6 = vld [vmem:[%s533_s15] sm:$0xff]   ;;  %s2355_s18 = sshll.u32 %s596_s20, 2  ;;  %s2620_s12 = sld [smem:[#allocation47_spill]] }
 0x11c   : > { %1212 = vmatpush3.bf16.msra.mxu0 %v1405_v1  ;;  %1220 = vmatpush3.bf16.msra.mxu1 %v1407_v3  ;;  %v1410_v7 = vld [vmem:[%s533_s15 + $0x8] sm:$0xff]   ;;  %v1176_v8 = vld [vmem:[%s507_s24] ss:$0 sm:$0xff]  ;;  %s605_s6 = scalar_lea.vmem [#allocation15], %s2355_s18  ;;  %s598_s0 = scalar_lea.vmem [#allocation14], %s2355_s18 }
 0x11d   : > { %1213 = vmatprep.subr.bf16.mxu0 %v1850_v0  ;;  %1221 = vmatprep.subr.bf16.mxu1 %v1850_v0  ;;  %v1180_v10 = vld [vmem:[%s524_s26] ss:$0 sm:$0xff]  ;;  %s859_s27 = sshll.u32 %s605_s6, 4  ;;  %s843_s2 = sshll.u32 %s598_s0, 4  ;;  %s2370_s27 = int_to_ptr.vmem [resolvable:$true] %s859_s27  ;;  %s2379_s2 = int_to_ptr.vmem [resolvable:$true] %s843_s2 }
 0x11e   : > { %s541_s19 = scalar_lea.vmem [#allocation13], %s2319_s23  ;;  %s2622_s7 = sld [smem:[#allocation46_spill]] }
 0x11f   : > { %s1191_s9 = sshll.u32 %s2618_s3, 2  ;;  %v1184_v23 = vld [vmem:[%s541_s19] ss:$0 sm:$0xff]  ;;  %s612_s3 = scalar_lea.vmem [#allocation17], %s2355_s18 }
 0x120   : > { %1214 = vmatpush3.bf16.msra.mxu0 %v1406_v2  ;;  %1222 = vmatpush3.bf16.msra.mxu1 %v1409_v4  ;;  %s839_s17 = sadd.s32 %s2619_s28, %s1191_s9  ;;  %s2386_s28 = sshll.u32 %s612_s3, 4  ;;  %s876_s28 = int_to_ptr.vmem [resolvable:$true] %s2386_s28 }
 0x121   : > { %1227 = vmatprep.subr.bf16.mxu0 %v1850_v0  ;;  %s2360_s21 = sshll.u32 %s839_s17, 6  ;;  %s2621_s24 = smov %s2620_s12 }
 0x122   : > { %s2368_s14 = scalar_lea.hbm %s2620_s12, %s2360_s21  ;;  %s822_s9 = scalar_lea.sflag [#allocation16], %s2316_s8 }
 0x123   : > { %1216 = vmatmul.mubr.msk.bf16.vlgmr.msra.gmra.mrb[0].mxu0 %vm638_vm1, %v614_v5  ;;  %1224 = vmatmul.mubr.msk.bf16.vlgmr.msra.gmra.mrb[0].mxu1 %vm638_vm1, %v614_v5  ;;  %s1621_s23 = scalar_lea.vmem %s2370_s27, 64  ;;  %p2623_p4 = scmp.ne.s32.totalorder %s2597_s25, 0 }
 0x124   : > { %1228 = vmatpush3.bf16.msra.mxu0 %v1408_v6  ;;  %1231 = vmatprep.mubr.msk.bf16.mxu0 %vm1851_vm0, %v1850_v0  ;;  %s2377_s15 = scalar_lea.hbm %s2622_s7, %s2360_s21  ;;  %p1622_p1 = scmp.ne.s32.totalorder %s2370_s27, %s1621_s23 }
 0x125   : > { %1229 = vmatprep.subr.bf16.mxu0 %v1850_v0  ;;  %s1852_s17 = smov [#allocation15]  }
 0x126   : > { %p1623_p3 = pnand %p1622_p1, %p2623_p4  ;;  %s1625_s1 = sshll.u32 %s1852_s17, 4  ;;  %s1626_s1 = int_to_ptr.vmem [resolvable:$false] %s1625_s1 }
 0x127   : > { %s1627_s5 = scalar_lea.vmem %s1626_s1, 128  ;;  %p1628_p9 = scmp.lt.s32.totalorder %s2370_s27, %s1626_s1 }
 0x128   : > { %1230 = vmatpush3.bf16.msra.mxu0 %v1410_v7  ;;  %p1624_p7 = pneg %p1623_p3  ;;  %p1629_p10 = scmp.lt.s32.totalorder %s1627_s5, %s1621_s23 }
 0x12a   : > { %p1630_p5 = por %p1629_p10, %p1628_p9 }
 0x12b   : > { %1232 = vmatmul.mubr.msk.bf16.vlgmr.msra.gmra.mrb[4].mxu0 %vm638_vm1, %v614_v5 }
 0x12c   : > { %p1631_p0 = pnand %p1630_p5, %p1624_p7 }
 0x1f6   : > { %v676_v9 = vpop.f32.mrb[0].mxu0  ;;  %v739_v14 = vpop.f32.mrb[0].mxu1 }
 0x1f7   : > { %v677_v11 = vadd.f32 %v1176_v8, %v676_v9  ;;  %v1217_v12 = vpop.f32.mrb[1].mxu0  ;;  %v740_v17 = vadd.f32 %v1180_v10, %v739_v14  ;;  %v1225_v18 = vpop.f32.mrb[1].mxu1 }
 0x1f8   : > { %v679_v13 = vpop.f32.mrb[2].mxu0  ;;  %v742_v19 = vpop.f32.mrb[2].mxu1 }
 0x1f9   : > { %v808_v15 = vmul.f32 0.35355338, %v677_v11  ;;  %v1218_v16 = vpop.f32.mrb[3].mxu0  ;;  %v812_v21 = vpack.c.bf16 %v740_v17, %v740_v17  ;;  %v1226_v22 = vpop.f32.mrb[3].mxu1 }
 0x1fb   : > { %v809_v20 = vpack.c.bf16 %v808_v15, %v808_v15  ;;  %813 = vst.msk [vmem:[%s605_s6] sm:$0xf] %vm810_vm2, %v812_v21 }
 0x1fd   : > { %811 = vst.msk [vmem:[%s598_s0] sm:$0xf] %vm810_vm2, %v809_v20 }
 0x1fe   : > { %v802_v24 = vpop.f32.mrb[4].mxu0 }
 0x1ff   : > { %1634 = shalt.err (!%p1631_p0)
}
 0x200   : > { %s1635_s6 = scalar_lea.hbm %s2368_s14, 64  ;;  %s1639_s19 = scalar_lea.hbm %s2621_s24, 512 }
 0x201   : > { %p1636_p8 = scmp.ne.s32.totalorder %s2368_s14, %s1635_s6  ;;  %p1640_p2 = scmp.lt.u32.totalorder %s2368_s14, %s2621_s24 }
 0x202   : > { %p1641_p6 = scmp.lt.u32.totalorder %s1639_s19, %s1635_s6  ;;  %p1643_p1 = scmp.lt.u32.totalorder %s1635_s6, %s2368_s14 }
 0x203   : > { %p1637_p11 = pnand %p1636_p8, %p2623_p4 }
 0x204   : > { %p1642_p13 = por %p1641_p6, %p1640_p2 }
 0x205   : > { %p1638_p12 = pneg %p1637_p11 }
 0x206   : > { %p1644_p3 = por %p1643_p1, %p1642_p13 }
 0x208   : > { %p1645_p7 = pnand %p1644_p3, %p1638_p12 }
 0x20a   : > { %1648 = shalt.err (!%p1645_p7)
}
 0x20b   : > { %1250 = dma.vmem_to_hbm [thread:$0]  (%p2623_p4), %s2370_s27, 64, %s2368_s14, %s822_s9   ;;  %v803_v25 = vadd.f32 %v1184_v23, %v802_v24  ;;  %v1233_v26 = vpop.f32.mrb[5].mxu0 }
 0x20c   : > { %s817_s23 = scalar_lea.sflag [#allocation4], %s596_s20  ;;  %s1649_s17 = scalar_lea.vmem %s2379_s2, 64 }
 0x20d   : > { %p1650_p9 = scmp.ne.s32.totalorder %s2379_s2, %s1649_s17  ;;  %s1853_s1 = smov [#allocation14]  }
 0x20e   : > { %s1653_s5 = sshll.u32 %s1853_s1, 4  ;;  %s1654_s5 = int_to_ptr.vmem [resolvable:$false] %s1653_s5 }
 0x20f   : > { %p1651_p10 = pnand %p1650_p9, %p2623_p4  ;;  %s1655_s6 = scalar_lea.vmem %s1654_s5, 128 }
 0x210   : > { %p1656_p0 = scmp.lt.s32.totalorder %s2379_s2, %s1654_s5  ;;  %p1657_p8 = scmp.lt.s32.totalorder %s1655_s6, %s1649_s17 }
 0x211   : > { %p1652_p5 = pneg %p1651_p10 }
 0x212   : > { %p1658_p11 = por %p1657_p8, %p1656_p0 }
 0x214   : > { %p1659_p12 = pnand %p1658_p11, %p1652_p5 }
 0x216   : > { %1662 = shalt.err (!%p1659_p12)
}
 0x217   : > { %s1663_s20 = scalar_lea.hbm %s2377_s15, 64  ;;  %s1667_s0 = scalar_lea.hbm %s2622_s7, 512 }
 0x218   : > { %p1664_p2 = scmp.ne.s32.totalorder %s2377_s15, %s1663_s20  ;;  %p1668_p1 = scmp.lt.u32.totalorder %s2377_s15, %s2622_s7 }
 0x219   : > { %p1669_p3 = scmp.lt.u32.totalorder %s1667_s0, %s1663_s20  ;;  %p1671_p9 = scmp.lt.u32.totalorder %s1663_s20, %s2377_s15 }
 0x21a   : > { %p1665_p6 = pnand %p1664_p2, %p2623_p4 }
 0x21b   : > { %p1670_p7 = por %p1669_p3, %p1668_p1 }
 0x21c   : > { %p1666_p13 = pneg %p1665_p6 }
 0x21d   : > { %p1672_p10 = por %p1671_p9, %p1670_p7 }
 0x21f   : > { %p1673_p5 = pnand %p1672_p10, %p1666_p13 }
 0x221   : > { %1676 = shalt.err (!%p1673_p5)
}
 0x222   : > { %1249 = dma.vmem_to_hbm [thread:$0]  (%p2623_p4), %s2379_s2, 64, %s2377_s15, %s817_s23   ;;  %v805_v27 = vpop.f32.mrb[6].mxu0  ;;  %v814_v28 = vpack.c.bf16 %v803_v25, %v803_v25 }
 0x223   : > { %v1234_v29 = vpop.f32.mrb[7].mxu0  ;;  %s2624_s17 = sld [smem:[#allocation48_spill]]  ;;  %s1677_s6 = scalar_lea.vmem %s876_s28, 64 }
 0x224   : > { %815 = vst.msk [vmem:[%s612_s3] sm:$0xf] %vm810_vm2, %v814_v28  ;;  %p1678_p0 = scmp.ne.s32.totalorder %s876_s28, %s1677_s6  ;;  %s1854_s20 = smov [#allocation17]  }
 0x225   : > { %s1681_s27 = sshll.u32 %s1854_s20, 4  ;;  %s1682_s27 = int_to_ptr.vmem [resolvable:$false] %s1681_s27 }
 0x226   : > { %p1679_p8 = pnand %p1678_p0, %p2623_p4  ;;  %s1683_s2 = scalar_lea.vmem %s1682_s27, 128 }
 0x227   : > { %p1684_p12 = scmp.lt.s32.totalorder %s876_s28, %s1682_s27  ;;  %p1685_p2 = scmp.lt.s32.totalorder %s1683_s2, %s1677_s6 }
 0x228   : > { %p1680_p11 = pneg %p1679_p8 }
 0x229   : > { %s2625_s1 = smov %s2624_s17  ;;  %s2439_s5 = scalar_lea.hbm %s2624_s17, %s2360_s21 }
 0x22a   : > { %p1686_p6 = por %p1685_p2, %p1684_p12 }
 0x22c   : > { %p1687_p13 = pnand %p1686_p6, %p1680_p11 }
 0x22e   : > { %1690 = shalt.err (!%p1687_p13)
}
 0x22f   : > { %s1691_s18 = scalar_lea.hbm %s2439_s5, 64  ;;  %s1695_s3 = scalar_lea.hbm %s2625_s1, 512 }
 0x230   : > { %p1692_p1 = scmp.ne.s32.totalorder %s2439_s5, %s1691_s18  ;;  %p1696_p9 = scmp.lt.u32.totalorder %s2439_s5, %s2625_s1 }
 0x231   : > { %p1697_p10 = scmp.lt.u32.totalorder %s1695_s3, %s1691_s18  ;;  %p1699_p0 = scmp.lt.u32.totalorder %s1691_s18, %s2439_s5 }
 0x232   : > { %p1693_p3 = pnand %p1692_p1, %p2623_p4 }
 0x233   : > { %p1698_p5 = por %p1697_p10, %p1696_p9 }
 0x234   : > { %p1694_p7 = pneg %p1693_p3 }
 0x235   : > { %p1700_p8 = por %p1699_p0, %p1698_p5 }
 0x237   : > { %p1701_p11 = pnand %p1700_p8, %p1694_p7 }
 0x239   : > { %1704 = shalt.err (!%p1701_p11)
}
 0x23a   : > { %1251 = dma.vmem_to_hbm [thread:$0]  (%p2623_p4), %s876_s28, 64, %s2439_s5, %s822_s9  }
 0x23b PF: > { %s2626_s0 = sld [smem:[#allocation38_spill]]  ;;  %p1288_p12 = scmp.ge.s32.totalorder %s1839_s22, 2 }
 0x23c   : > { %s887_s12 = sand.u32 1, %s1787_s30  }
 0x23d   : > { %s888_s19 = scalar_lea.sflag [#allocation4], %s887_s12 }
 0x241   : > { %p2627_p2 = scmp.ne.s32.totalorder %s2626_s0, 0 }
 0x243   : > { %p1278_p6 = pnand %p1288_p12, %p2627_p2 }
 0x245   : > { %1778 = dma.done.wait (!%p1278_p6), %s888_s19, 64  }
 0x246   : > { %1780 = vsyncadd (!%p1278_p6), %s888_s19, 4294967232  ;;  %s2628_s11 = sadd.s32 4294967294, %s1839_s22  }
 0x247   : > { %s896_s26 = sand.u32 1, %s2628_s11  }
 0x248   : > { %s897_s17 = scalar_lea.sflag [#allocation16], %s896_s26 }
 0x249   : > { %1782 = dma.done.wait (!%p1278_p6), %s897_s17, 128  }
 0x24a   : > { %1784 = vsyncadd (!%p1278_p6), %s897_s17, 4294967168  ;;  %s38_s22 = sadd.s32 1, %s1839_s22   ;;  %s2630_s8 = sld [smem:[#allocation24_spill]] }
 0x24b   : > { %p2471_p4 = scmp.ge.s32.totalorder %s38_s22, 10   ;;  %s2631_s11 = sld [smem:[#allocation37_spill]] }
 0x24c   : > { %s2632_s28 = sld [smem:[#allocation25_spill]]  ;;  %s2633_s14 = sld [smem:[#allocation35_spill]] }
 0x24d   : > { %s2634_s9 = sld [smem:[#allocation26_spill]]  ;;  %s2635_s17 = sld [smem:[#allocation36_spill]] }
 0x24e   : > { %s2636_s18 = sld [smem:[#allocation29_spill]]  ;;  %s2637_s19 = sld [smem:[#allocation30_spill]] }
 0x24f   : > { %s2638_s20 = sld [smem:[#allocation33_spill]]  ;;  %s2639_s21 = sld [smem:[#allocation34_spill]] }
 0x250   : > { %s2640_s30 = smov %s1791_s10  ;;  %s2641_s10 = smov %s2630_s8 }
 0x251   : > { %s2642_s12 = smov %s1803_s13  ;;  %s2644_s15 = smov %s1815_s16 }
 0x252   : > { %s2643_s13 = smov %s2632_s28  ;;  %37 = sbr.rel (!%p2471_p4) target bundleno = 29 (0x1d), region = 197 }
 0x253   : > { %s2645_s16 = smov %s2634_s9 }
 0x259   :  { %911 = vsyncpa [#allocation3], 1 }
 0x25a   :  { %913 = vsyncpa [#allocation3 + $0x1], 1 }
 0x25b   :  { %914 = vsyncpa [#allocation6], 1 }
 0x25c   :  { %916 = vsyncpa [#allocation6 + $0x1], 1 }
 0x25d   :  { %917 = vsyncpa [#allocation9], 1 }
 0x25e   :  { %919 = vsyncpa [#allocation9 + $0x1], 1 }
 0x25f   :  { %920 = vsyncpa [#allocation12], 1 }
 0x260   :  { %922 = vsyncpa [#allocation12 + $0x1], 1 }
 0x261   :  { %923 = vsyncpa [#allocation4], 1 }
 0x262   :  { %925 = vsyncpa [#allocation4 + $0x1], 1 }
 0x263   :  { %926 = vsyncpa [#allocation16], 1 }
 0x264   :  { %928 = vsyncpa [#allocation16 + $0x1], 1 }

</bundles_post_ra>
